<compile_context>
chip_gen: v6e
topology: v6e:2x2x1
jax: 0.10.0
libtpu: 0.0.40
codegen_flags: <defaults>
</compile_context>

<pallas_src>
import numpy as np
import jax
import jax.numpy as jnp
from jax.experimental import pallas as pl
from jax.experimental.pallas import tpu as pltpu

# ----------------------------- model config ---------------------------------
NUM_EXPERTS = 4
NUM_TASKS = 2
UNITS = 32                      # expert output dim
EXPERT_HIDDEN = 64              # expert_hidden_units = [64]
TOWER_HIDDEN = 32               # tower_hidden_units  = [32]
COND1_LEN = 2
COND2_LEN = 2
COND_LEN = COND1_LEN + COND2_LEN
SPARSE_FEATS = [                # (feat_onehot_dim, embed_dim)
    (10, 8),
    (12, 8),
    (7, 8),
]
DENSE_LEN = 4
NUM_FEATURE = sum(e for _, e in SPARSE_FEATS) + DENSE_LEN    # 24 + 4 = 28
FUSED_IN = NUM_FEATURE + COND_LEN                            # 32 (x ++ cond)
L0_EXPERT_COLS = NUM_EXPERTS * EXPERT_HIDDEN                 # 256
L0_OUT = L0_EXPERT_COLS + NUM_TASKS * NUM_EXPERTS            # 264
BATCH = 16


def _round_up(x, m):
    return (x + m - 1) // m * m


# ------------------------------ Pallas kernel --------------------------------
def _mmoe_kernel(xin_ref,
                 w0_ref, b0_ref, ew1_ref, eb1_ref,
                 summ_ref, spread_ref,
                 tw0_ref, tw0x_ref, tb0_ref, tw1_ref, tb1_ref,
                 out_ref):
    """Fused MMOE forward for one batch tile.

    xin:  [Bt, 32]   = [embeds+dense (28), cond1 (2), cond2 (2)]      f32
    w0:   [32, 264]  experts-L0 (cols 0..255) + both gates (256..263) bf16
    b0:   [1, 264]   f32
    ew1:  [256, 128] block-diag over experts                          bf16
    eb1:  [1, 128]   f32
    summ: [8, 8]     block-ones (per-task softmax denominator)        f32
    spread: [8, 256] 0/1: gate(t,e) -> 32 lanes of expert e, task t   f32
    tw0:  [256, 64]  block-diag over tasks, tiled over experts        bf16
    tw0x: [32, 64]   cond rows of tower-0 weights (x rows are zero)   bf16
    tb0:  [1, 64]    f32
    tw1:  [64, 2]    block-diag tower output layers                   bf16
    tb1:  [1, 2]     f32
    out:  [Bt, 2]
    """
    xin = xin_ref[...]                                   # [Bt, 32] f32
    x16 = xin.astype(jnp.bfloat16)

    # ---- experts layer-0 + both gates in ONE matmul -------------------------
    a0 = jnp.dot(x16, w0_ref[...],
                 preferred_element_type=jnp.float32) + b0_ref[...]   # [Bt, 264]
    h = jnp.maximum(a0[:, :L0_EXPERT_COLS], 0.0)                     # [Bt, 256]
    gl = a0[:, L0_EXPERT_COLS:]                                      # [Bt, 8] (128-aligned)

    # ---- experts layer-1 (block-diagonal over experts) ----------------------
    eo = jnp.dot(h.astype(jnp.bfloat16), ew1_ref[...],
                 preferred_element_type=jnp.float32) + eb1_ref[...]  # [Bt, 128]

    # ---- both-task gate softmax, vectorized (exact arithmetic) --------------
    m = jnp.max(gl, axis=1, keepdims=True)               # global row max (shift-invariant per group)
    ex = jnp.exp(gl - m)                                  # [Bt, 8]
    gsum = jnp.dot(ex, summ_ref[...],
                   preferred_element_type=jnp.float32)    # per-group sums, broadcast  [Bt, 8]
    gate = ex / gsum                                      # exact softmax              [Bt, 8]

    # broadcast gate(t,e) over expert e's 32 lanes for both tasks at once
    gate_wide = jnp.dot(gate, spread_ref[...],
                        preferred_element_type=jnp.float32)           # [Bt, 256]
    eo2 = jnp.concatenate([eo] * NUM_TASKS, axis=1)                    # [Bt, 256] (128-aligned)
    prod = gate_wide * eo2                                             # [Bt, 256]

    # ---- both towers fused (sum over experts folded into tw0_rep_bd) --------
    th = (jnp.dot(prod.astype(jnp.bfloat16), tw0_ref[...],
                  preferred_element_type=jnp.float32)
          + jnp.dot(x16, tw0x_ref[...], preferred_element_type=jnp.float32)
          + tb0_ref[...])
    th = jnp.maximum(th, 0.0)                                          # [Bt, 64]
    out_ref[...] = (jnp.dot(th.astype(jnp.bfloat16), tw1_ref[...],
                            preferred_element_type=jnp.float32)
                    + tb1_ref[...])                                    # [Bt, 2]


WEIGHT_ORDER = ("w0", "b0", "ew1", "eb1", "summ", "spread",
                "tw0", "tw0x", "tb0", "tw1", "tb1")


def mmoe_pallas(xin, packed, *, batch_tile=512, min_grid_steps=1):
    """xin: [B, FUSED_IN] f32 (x columns 0..27, cond columns 28..31)."""
    B = xin.shape[0]
    bt = min(_round_up(B, 8), _round_up(batch_tile, 8))
    if min_grid_steps > 1:
        # v7x: keep >=2 parallel grid steps so both TensorCores get work.
        bt = min(bt, max(8, _round_up(-(-B // min_grid_steps), 8)))
    Bp = _round_up(B, bt)
    if Bp != B:
        xin = jnp.pad(xin, ((0, Bp - B), (0, 0)))
    grid = (Bp // bt,)

    def row_spec(ncols):
        return pl.BlockSpec((bt, ncols), lambda i: (i, 0))

    def resident_spec(arr):      # whole weight, constant index_map -> stays in VMEM
        return pl.BlockSpec(arr.shape, lambda i: (0, 0))

    weights = tuple(packed[k] for k in WEIGHT_ORDER)
    in_specs = [row_spec(FUSED_IN)] + [resident_spec(w) for w in weights]

    out = pl.pallas_call(
        _mmoe_kernel,
        out_shape=jax.ShapeDtypeStruct((Bp, NUM_TASKS), jnp.float32),
        grid=grid,
        in_specs=in_specs,
        out_specs=row_spec(NUM_TASKS),
        compiler_params=pltpu.CompilerParams(dimension_semantics=("parallel",)),
    )(xin, *weights)
    return out[:B]


# ------------------------------ parameter init --------------------------------
def init_params(key):
    ks = jax.random.split(key, 16)

    def unif(k, shape, fan_in):
        bound = 1.0 / np.sqrt(fan_in)
        return jax.random.uniform(k, shape, jnp.float32, -bound, bound)

    params = {
        # embedding tables (lookup done in JAX glue)
        "emb": [unif(ks[i], (dim, ed), ed) for i, (dim, ed) in enumerate(SPARSE_FEATS)],
        # experts
        "ew0": unif(ks[4], (NUM_EXPERTS, NUM_FEATURE, EXPERT_HIDDEN), NUM_FEATURE),
        "eb0": unif(ks[5], (NUM_EXPERTS, EXPERT_HIDDEN), NUM_FEATURE),
        "ew1": unif(ks[6], (NUM_EXPERTS, EXPERT_HIDDEN, UNITS), EXPERT_HIDDEN),
        "eb1": unif(ks[7], (NUM_EXPERTS, UNITS), EXPERT_HIDDEN),
        # gates
        "gw": unif(ks[8], (NUM_TASKS, NUM_FEATURE, NUM_EXPERTS), NUM_FEATURE),
        "gb": unif(ks[9], (NUM_TASKS, NUM_EXPERTS), NUM_FEATURE),
        # towers (input = units + cond1 + cond2 = 36)
        "tw0": unif(ks[10], (NUM_TASKS, UNITS + COND_LEN, TOWER_HIDDEN), UNITS + COND_LEN),
        "tb0": unif(ks[11], (NUM_TASKS, TOWER_HIDDEN), UNITS + COND_LEN),
        "tw1": unif(ks[12], (NUM_TASKS, TOWER_HIDDEN, 1), TOWER_HIDDEN),
        "tb1": unif(ks[13], (NUM_TASKS, 1), TOWER_HIDDEN),
    }
    return params


def pack_params(p):
    """Build the fused / block-diagonal bf16 weight layout ONCE (not per call)."""
    E, T, U, H, Ht = NUM_EXPERTS, NUM_TASKS, UNITS, EXPERT_HIDDEN, TOWER_HIDDEN
    F, C, FIN = NUM_FEATURE, COND_LEN, FUSED_IN
    MM = jnp.bfloat16

    # layer 0: experts (cols 0..E*H-1, col = e*H + h) + gates (cols E*H + t*E + e)
    ew0_flat = jnp.transpose(p["ew0"], (1, 0, 2)).reshape(F, E * H)
    gw_flat = jnp.transpose(p["gw"], (1, 0, 2)).reshape(F, T * E)
    w0 = jnp.zeros((FIN, L0_OUT), jnp.float32)
    w0 = w0.at[:F, :E * H].set(ew0_flat)
    w0 = w0.at[:F, E * H:].set(gw_flat)                    # cond rows stay zero
    b0 = jnp.concatenate([p["eb0"].reshape(1, E * H),
                          p["gb"].reshape(1, T * E)], axis=1)

    # layer 1: block-diagonal over experts
    ew1_bd = jnp.zeros((E * H, E * U), jnp.float32)
    for e in range(E):
        ew1_bd = ew1_bd.at[e * H:(e + 1) * H, e * U:(e + 1) * U].set(p["ew1"][e])
    eb1 = p["eb1"].reshape(1, E * U)

    # gate helpers (constant 0/1, kept f32 so gate math stays exact)
    summ = jnp.kron(jnp.eye(T, dtype=jnp.float32), jnp.ones((E, E), jnp.float32))      # [8,8]
    spread = jnp.kron(jnp.eye(T * E, dtype=jnp.float32), jnp.ones((1, U), jnp.float32))  # [8,256]

    # tower layer 0: mixed part tiled over experts (folds the expert sum),
    # block-diagonal across tasks; cond part consumes the fused input (zero x-rows).
    tw0_rep_bd = jnp.zeros((T * E * U, T * Ht), jnp.float32)
    tw0x = jnp.zeros((FIN, T * Ht), jnp.float32)
    for t in range(T):
        rep = jnp.tile(p["tw0"][t][:U, :], (E, 1))                     # [E*U, Ht]
        tw0_rep_bd = tw0_rep_bd.at[t * E * U:(t + 1) * E * U,
                                   t * Ht:(t + 1) * Ht].set(rep)
        tw0x = tw0x.at[F:, t * Ht:(t + 1) * Ht].set(p["tw0"][t][U:, :])  # cond rows
    tb0 = p["tb0"].reshape(1, T * Ht)

    # tower output layers, block-diagonal
    tw1_bd = jnp.zeros((T * Ht, T), jnp.float32)
    for t in range(T):
        tw1_bd = tw1_bd.at[t * Ht:(t + 1) * Ht, t:t + 1].set(p["tw1"][t])
    tb1 = p["tb1"].reshape(1, T)

    return {"w0": w0.astype(MM), "b0": b0,
            "ew1": ew1_bd.astype(MM), "eb1": eb1,
            "summ": summ, "spread": spread,
            "tw0": tw0_rep_bd.astype(MM), "tw0x": tw0x.astype(MM), "tb0": tb0,
            "tw1": tw1_bd.astype(MM), "tb1": tb1}


# ------------------------------ JAX glue (embedding + split + merge) ----------
def mmoe_forward(x, params, packed, *, batch_tile=512, min_grid_steps=1):
    """x: [B, cond1 + cond2 + n_sparse + n_dense] float32 (matches torch layout)."""
    c1 = COND1_LEN
    c2 = COND1_LEN + COND2_LEN
    c3 = c2 + len(SPARSE_FEATS)
    cond1 = x[:, :c1]
    cond2 = x[:, c1:c2]
    sparse = x[:, c2:c3].astype(jnp.int32)
    dense = x[:, c3:]

    embeds = [jnp.take(params["emb"][i], sparse[:, i], axis=0)
              for i in range(len(SPARSE_FEATS))]
    # fused input: [embeds, dense, cond1, cond2] -> single lane-dense [B, 32] stream
    xin = jnp.concatenate(embeds + [dense, cond1, cond2], axis=1).astype(jnp.float32)

    return mmoe_pallas(xin, packed, batch_tile=batch_tile, min_grid_steps=min_grid_steps)


# ------------------------------ pure-JAX reference -----------------------------
def mmoe_reference(x, params):
    c1 = COND1_LEN
    c2 = COND1_LEN + COND2_LEN
    c3 = c2 + len(SPARSE_FEATS)
    cond1, cond2 = x[:, :c1], x[:, c1:c2]
    sparse = x[:, c2:c3].astype(jnp.int32)
    dense = x[:, c3:]
    embeds = [jnp.take(params["emb"][i], sparse[:, i], axis=0)
              for i in range(len(SPARSE_FEATS))]
    inp = jnp.concatenate(embeds + [dense], axis=1).astype(jnp.float32)

    experts = []
    for e in range(NUM_EXPERTS):
        h = jax.nn.relu(inp @ params["ew0"][e] + params["eb0"][e])
        experts.append(h @ params["ew1"][e] + params["eb1"][e])
    experts = jnp.stack(experts, axis=1)                        # [B, E, U]

    outs = []
    for t in range(NUM_TASKS):
        g = jax.nn.softmax(inp @ params["gw"][t] + params["gb"][t], axis=1)
        mixed = jnp.sum(g[:, :, None] * experts, axis=1)        # [B, U]
        tin = jnp.concatenate([mixed, cond1, cond2], axis=1)
        h = jax.nn.relu(tin @ params["tw0"][t] + params["tb0"][t])
        outs.append(h @ params["tw1"][t] + params["tb1"][t])
    return jnp.concatenate(outs, axis=1)


# ------------------------------ main -------------------------------------------
if __name__ == "__main__":
    key = jax.random.PRNGKey(0)
    kp, kc, ks, kd = jax.random.split(key, 4)

    params = init_params(kp)
    packed = pack_params(params)

    cond = jax.random.normal(kc, (BATCH, COND_LEN), jnp.float32)
    sparse_ids = jnp.stack(
        [jax.random.randint(jax.random.fold_in(ks, i), (BATCH,), 0, SPARSE_FEATS[i][0])
         for i in range(len(SPARSE_FEATS))], axis=1).astype(jnp.float32)
    dense = jax.random.normal(kd, (BATCH, DENSE_LEN), jnp.float32)

    x = jnp.concatenate([cond, sparse_ids, dense], axis=1)      # [B, 2+2+3+4] = [16, 11]

    ref = jax.block_until_ready(mmoe_reference(x, params))

    # Default: one grid step covering the whole (tiny) batch — no per-step overhead.
    out = jax.block_until_ready(mmoe_forward(x, params, packed))
    assert out.shape == (BATCH, NUM_TASKS), out.shape
    # tolerance covers bf16 matmul operands (f32 accumulation, exact gate softmax).
    np.testing.assert_allclose(np.asarray(out), np.asarray(ref), rtol=3e-2, atol=3e-2)

    # Also exercise the multi-step "parallel" batch grid (v7x two-TC path).
    out2 = jax.block_until_ready(
        mmoe_forward(x, params, packed, batch_tile=8, min_grid_steps=2))
    np.testing.assert_allclose(np.asarray(out2), np.asarray(ref), rtol=3e-2, atol=3e-2)

    print("KERNEL_OK")
</pallas_src>

<mosaic_0001>
module attributes {stable_mosaic.version = 11 : i64} {
  func.func @_mmoe_kernel(%arg0: i32, %arg1: memref<16x32xf32, #tpu.memory_space<vmem>>, %arg2: memref<32x264xbf16, #tpu.memory_space<vmem>>, %arg3: memref<1x264xf32, #tpu.memory_space<vmem>>, %arg4: memref<256x128xbf16, #tpu.memory_space<vmem>>, %arg5: memref<1x128xf32, #tpu.memory_space<vmem>>, %arg6: memref<8x8xf32, #tpu.memory_space<vmem>>, %arg7: memref<8x256xf32, #tpu.memory_space<vmem>>, %arg8: memref<256x64xbf16, #tpu.memory_space<vmem>>, %arg9: memref<32x64xbf16, #tpu.memory_space<vmem>>, %arg10: memref<1x64xf32, #tpu.memory_space<vmem>>, %arg11: memref<64x2xbf16, #tpu.memory_space<vmem>>, %arg12: memref<1x2xf32, #tpu.memory_space<vmem>>, %arg13: memref<16x2xf32, #tpu.memory_space<vmem>>) attributes {dimension_semantics = [#tpu.dimension_semantics<parallel>], iteration_bounds = array<i64: 1>, scalar_prefetch = 0 : i64, scratch_operands = 0 : i64, tpu.core_type = #tpu.core_type<tc>, window_params = [{transform_indices = @transform_0, window_bounds = array<i64: 16, 32>}, {pipeline_mode = #tpu.pipeline_mode<synchronous>, transform_indices = @transform_1, window_bounds = array<i64: 32, 264>}, {pipeline_mode = #tpu.pipeline_mode<synchronous>, transform_indices = @transform_2, window_bounds = array<i64: 1, 264>}, {pipeline_mode = #tpu.pipeline_mode<synchronous>, transform_indices = @transform_3, window_bounds = array<i64: 256, 128>}, {pipeline_mode = #tpu.pipeline_mode<synchronous>, transform_indices = @transform_4, window_bounds = array<i64: 1, 128>}, {pipeline_mode = #tpu.pipeline_mode<synchronous>, transform_indices = @transform_5, window_bounds = array<i64: 8, 8>}, {pipeline_mode = #tpu.pipeline_mode<synchronous>, transform_indices = @transform_6, window_bounds = array<i64: 8, 256>}, {pipeline_mode = #tpu.pipeline_mode<synchronous>, transform_indices = @transform_7, window_bounds = array<i64: 256, 64>}, {pipeline_mode = #tpu.pipeline_mode<synchronous>, transform_indices = @transform_8, window_bounds = array<i64: 32, 64>}, {pipeline_mode = #tpu.pipeline_mode<synchronous>, transform_indices = @transform_9, window_bounds = array<i64: 1, 64>}, {pipeline_mode = #tpu.pipeline_mode<synchronous>, transform_indices = @transform_10, window_bounds = array<i64: 64, 2>}, {pipeline_mode = #tpu.pipeline_mode<synchronous>, transform_indices = @transform_11, window_bounds = array<i64: 1, 2>}, {transform_indices = @transform_12, window_bounds = array<i64: 16, 2>}]} {
    %c0 = arith.constant 0 : index
    %c0_0 = arith.constant 0 : index
    %0 = vector.load %arg1[%c0, %c0_0] : memref<16x32xf32, #tpu.memory_space<vmem>>, vector<16x32xf32>
    %1 = arith.truncf %0 : vector<16x32xf32> to vector<16x32xbf16>
    %c0_1 = arith.constant 0 : index
    %c0_2 = arith.constant 0 : index
    %2 = vector.load %arg2[%c0_1, %c0_2] : memref<32x264xbf16, #tpu.memory_space<vmem>>, vector<32x264xbf16>
    %cst = arith.constant dense<0.000000e+00> : vector<16x264xf32>
    %3 = tpu.matmul %1, %2, %cst {dimension_numbers = #tpu.dot_dimension_numbers<[1], [0], [0], [1], [0, 0, 1, 1], [], []>} : vector<16x32xbf16>, vector<32x264xbf16>, vector<16x264xf32> -> vector<16x264xf32>
    %c0_3 = arith.constant 0 : index
    %c0_4 = arith.constant 0 : index
    %4 = vector.load %arg3[%c0_3, %c0_4] : memref<1x264xf32, #tpu.memory_space<vmem>>, vector<1x264xf32>
    %5 = vector.broadcast %4 : vector<1x264xf32> to vector<16x264xf32>
    %6 = arith.addf %3, %5 : vector<16x264xf32>
    %7 = vector.extract_strided_slice %6 {offsets = [0, 0], sizes = [16, 256], strides = [1, 1]} : vector<16x264xf32> to vector<16x256xf32>
    %cst_5 = arith.constant 0.000000e+00 : f32
    %8 = vector.broadcast %cst_5 : f32 to vector<16x256xf32>
    %9 = arith.maximumf %7, %8 : vector<16x256xf32>
    %10 = vector.extract_strided_slice %6 {offsets = [0, 256], sizes = [16, 8], strides = [1, 1]} : vector<16x264xf32> to vector<16x8xf32>
    %11 = arith.truncf %9 : vector<16x256xf32> to vector<16x256xbf16>
    %c0_6 = arith.constant 0 : index
    %c0_7 = arith.constant 0 : index
    %12 = vector.load %arg4[%c0_6, %c0_7] : memref<256x128xbf16, #tpu.memory_space<vmem>>, vector<256x128xbf16>
    %cst_8 = arith.constant dense<0.000000e+00> : vector<16x128xf32>
    %13 = tpu.matmul %11, %12, %cst_8 {dimension_numbers = #tpu.dot_dimension_numbers<[1], [0], [0], [1], [0, 0, 1, 1], [], []>} : vector<16x256xbf16>, vector<256x128xbf16>, vector<16x128xf32> -> vector<16x128xf32>
    %c0_9 = arith.constant 0 : index
    %c0_10 = arith.constant 0 : index
    %14 = vector.load %arg5[%c0_9, %c0_10] : memref<1x128xf32, #tpu.memory_space<vmem>>, vector<1x128xf32>
    %15 = vector.broadcast %14 : vector<1x128xf32> to vector<16x128xf32>
    %16 = arith.addf %13, %15 : vector<16x128xf32>
    %cst_11 = arith.constant dense<0xFF800000> : vector<16xf32>
    %17 = vector.multi_reduction <maximumf>, %10, %cst_11 [1] : vector<16x8xf32> to vector<16xf32>
    %18 = vector.shape_cast %17 : vector<16xf32> to vector<16x1xf32>
    %19 = vector.broadcast %18 : vector<16x1xf32> to vector<16x8xf32>
    %20 = arith.subf %10, %19 : vector<16x8xf32>
    %21 = math.exp %20 : vector<16x8xf32>
    %c0_12 = arith.constant 0 : index
    %c0_13 = arith.constant 0 : index
    %22 = vector.load %arg6[%c0_12, %c0_13] : memref<8x8xf32, #tpu.memory_space<vmem>>, vector<8x8xf32>
    %cst_14 = arith.constant dense<0.000000e+00> : vector<16x8xf32>
    %23 = tpu.matmul %21, %22, %cst_14 {dimension_numbers = #tpu.dot_dimension_numbers<[1], [0], [0], [1], [0, 0, 1, 1], [], []>} : vector<16x8xf32>, vector<8x8xf32>, vector<16x8xf32> -> vector<16x8xf32>
    %24 = arith.divf %21, %23 : vector<16x8xf32>
    %c0_15 = arith.constant 0 : index
    %c0_16 = arith.constant 0 : index
    %25 = vector.load %arg7[%c0_15, %c0_16] : memref<8x256xf32, #tpu.memory_space<vmem>>, vector<8x256xf32>
    %cst_17 = arith.constant dense<0.000000e+00> : vector<16x256xf32>
    %26 = tpu.matmul %24, %25, %cst_17 {dimension_numbers = #tpu.dot_dimension_numbers<[1], [0], [0], [1], [0, 0, 1, 1], [], []>} : vector<16x8xf32>, vector<8x256xf32>, vector<16x256xf32> -> vector<16x256xf32>
    %27 = tpu.concatenate %16, %16 in 1 : vector<16x128xf32>, vector<16x128xf32> -> vector<16x256xf32>
    %28 = arith.mulf %26, %27 : vector<16x256xf32>
    %29 = arith.truncf %28 : vector<16x256xf32> to vector<16x256xbf16>
    %c0_18 = arith.constant 0 : index
    %c0_19 = arith.constant 0 : index
    %30 = vector.load %arg8[%c0_18, %c0_19] : memref<256x64xbf16, #tpu.memory_space<vmem>>, vector<256x64xbf16>
    %cst_20 = arith.constant dense<0.000000e+00> : vector<16x64xf32>
    %31 = tpu.matmul %29, %30, %cst_20 {dimension_numbers = #tpu.dot_dimension_numbers<[1], [0], [0], [1], [0, 0, 1, 1], [], []>} : vector<16x256xbf16>, vector<256x64xbf16>, vector<16x64xf32> -> vector<16x64xf32>
    %c0_21 = arith.constant 0 : index
    %c0_22 = arith.constant 0 : index
    %32 = vector.load %arg9[%c0_21, %c0_22] : memref<32x64xbf16, #tpu.memory_space<vmem>>, vector<32x64xbf16>
    %cst_23 = arith.constant dense<0.000000e+00> : vector<16x64xf32>
    %33 = tpu.matmul %1, %32, %cst_23 {dimension_numbers = #tpu.dot_dimension_numbers<[1], [0], [0], [1], [0, 0, 1, 1], [], []>} : vector<16x32xbf16>, vector<32x64xbf16>, vector<16x64xf32> -> vector<16x64xf32>
    %34 = arith.addf %31, %33 : vector<16x64xf32>
    %c0_24 = arith.constant 0 : index
    %c0_25 = arith.constant 0 : index
    %35 = vector.load %arg10[%c0_24, %c0_25] : memref<1x64xf32, #tpu.memory_space<vmem>>, vector<1x64xf32>
    %36 = vector.broadcast %35 : vector<1x64xf32> to vector<16x64xf32>
    %37 = arith.addf %34, %36 : vector<16x64xf32>
    %cst_26 = arith.constant 0.000000e+00 : f32
    %38 = vector.broadcast %cst_26 : f32 to vector<16x64xf32>
    %39 = arith.maximumf %37, %38 : vector<16x64xf32>
    %40 = arith.truncf %39 : vector<16x64xf32> to vector<16x64xbf16>
    %c0_27 = arith.constant 0 : index
    %c0_28 = arith.constant 0 : index
    %41 = vector.load %arg11[%c0_27, %c0_28] : memref<64x2xbf16, #tpu.memory_space<vmem>>, vector<64x2xbf16>
    %cst_29 = arith.constant dense<0.000000e+00> : vector<16x2xf32>
    %42 = tpu.matmul %40, %41, %cst_29 {dimension_numbers = #tpu.dot_dimension_numbers<[1], [0], [0], [1], [0, 0, 1, 1], [], []>} : vector<16x64xbf16>, vector<64x2xbf16>, vector<16x2xf32> -> vector<16x2xf32>
    %c0_30 = arith.constant 0 : index
    %c0_31 = arith.constant 0 : index
    %43 = vector.load %arg12[%c0_30, %c0_31] : memref<1x2xf32, #tpu.memory_space<vmem>>, vector<1x2xf32>
    %44 = vector.broadcast %43 : vector<1x2xf32> to vector<16x2xf32>
    %45 = arith.addf %42, %44 : vector<16x2xf32>
    %c0_32 = arith.constant 0 : index
    %c0_33 = arith.constant 0 : index
    %46 = vector.load %arg13[%c0_32, %c0_33] : memref<16x2xf32, #tpu.memory_space<vmem>>, vector<16x2xf32>
    tpu.vector_store %arg13[%c0_32, %c0_33], %45 {strides = array<i32>} : memref<16x2xf32, #tpu.memory_space<vmem>>, vector<16x2xf32>,
    return
  }
  func.func @transform_0(%arg0: i32) -> (i32, i32) {
    %c0_i32 = arith.constant 0 : i32
    %c0_i32_0 = arith.constant 0 : i32
    return %arg0, %c0_i32 : i32, i32
  }
  func.func @transform_1(%arg0: i32) -> (i32, i32) {
    %c0_i32 = arith.constant 0 : i32
    %c0_i32_0 = arith.constant 0 : i32
    %c0_i32_1 = arith.constant 0 : i32
    return %c0_i32, %c0_i32_0 : i32, i32
  }
  func.func @transform_2(%arg0: i32) -> (i32, i32) {
    %c0_i32 = arith.constant 0 : i32
    %c0_i32_0 = arith.constant 0 : i32
    %c0_i32_1 = arith.constant 0 : i32
    return %c0_i32, %c0_i32_0 : i32, i32
  }
  func.func @transform_3(%arg0: i32) -> (i32, i32) {
    %c0_i32 = arith.constant 0 : i32
    %c0_i32_0 = arith.constant 0 : i32
    %c0_i32_1 = arith.constant 0 : i32
    return %c0_i32, %c0_i32_0 : i32, i32
  }
  func.func @transform_4(%arg0: i32) -> (i32, i32) {
    %c0_i32 = arith.constant 0 : i32
    %c0_i32_0 = arith.constant 0 : i32
    %c0_i32_1 = arith.constant 0 : i32
    return %c0_i32, %c0_i32_0 : i32, i32
  }
  func.func @transform_5(%arg0: i32) -> (i32, i32) {
    %c0_i32 = arith.constant 0 : i32
    %c0_i32_0 = arith.constant 0 : i32
    %c0_i32_1 = arith.constant 0 : i32
    return %c0_i32, %c0_i32_0 : i32, i32
  }
  func.func @transform_6(%arg0: i32) -> (i32, i32) {
    %c0_i32 = arith.constant 0 : i32
    %c0_i32_0 = arith.constant 0 : i32
    %c0_i32_1 = arith.constant 0 : i32
    return %c0_i32, %c0_i32_0 : i32, i32
  }
  func.func @transform_7(%arg0: i32) -> (i32, i32) {
    %c0_i32 = arith.constant 0 : i32
    %c0_i32_0 = arith.constant 0 : i32
    %c0_i32_1 = arith.constant 0 : i32
    return %c0_i32, %c0_i32_0 : i32, i32
  }
  func.func @transform_8(%arg0: i32) -> (i32, i32) {
    %c0_i32 = arith.constant 0 : i32
    %c0_i32_0 = arith.constant 0 : i32
    %c0_i32_1 = arith.constant 0 : i32
    return %c0_i32, %c0_i32_0 : i32, i32
  }
  func.func @transform_9(%arg0: i32) -> (i32, i32) {
    %c0_i32 = arith.constant 0 : i32
    %c0_i32_0 = arith.constant 0 : i32
    %c0_i32_1 = arith.constant 0 : i32
    return %c0_i32, %c0_i32_0 : i32, i32
  }
  func.func @transform_10(%arg0: i32) -> (i32, i32) {
    %c0_i32 = arith.constant 0 : i32
    %c0_i32_0 = arith.constant 0 : i32
    %c0_i32_1 = arith.constant 0 : i32
    return %c0_i32, %c0_i32_0 : i32, i32
  }
  func.func @transform_11(%arg0: i32) -> (i32, i32) {
    %c0_i32 = arith.constant 0 : i32
    %c0_i32_0 = arith.constant 0 : i32
    %c0_i32_1 = arith.constant 0 : i32
    return %c0_i32, %c0_i32_0 : i32, i32
  }
  func.func @transform_12(%arg0: i32) -> (i32, i32) {
    %c0_i32 = arith.constant 0 : i32
    %c0_i32_0 = arith.constant 0 : i32
    return %arg0, %c0_i32 : i32, i32
  }
}

</mosaic_0001>

<bundles_post_ra>
// kernel: tpu_custom_call.1
= control target key start
LH: loop header
LB: loop body
LE: loop exit
PB: predicated region body
PF: predicated region fallthrough
CT: control target
= control target key end

     0   :  { %17 = vsyncpa [#allocation3], 0  ;;  %s1441_s0 = inlined_call_operand.vmem [shape: f32[16,32], index: 0, kind: input, shape index: {}]   ;;  %s1442_s1 = inlined_call_operand.vmem [shape: bf16[32,264], index: 1, kind: input, shape index: {}]   ;;  %s1443_s2 = inlined_call_operand.hbm [shape: f32[1,264], index: 2, kind: input, shape index: {}]   ;;  %s1444_s3 = inlined_call_operand.vmem [shape: bf16[256,128], index: 3, kind: input, shape index: {}]   ;;  %s1445_s4 = inlined_call_operand.hbm [shape: f32[1,128], index: 4, kind: input, shape index: {}]   ;;  %s1446_s5 = inlined_call_operand.vmem [shape: f32[8,8], index: 5, kind: input, shape index: {}]   ;;  %s1447_s6 = inlined_call_operand.vmem [shape: f32[8,256], index: 6, kind: input, shape index: {}]   ;;  %s1448_s7 = inlined_call_operand.vmem [shape: bf16[256,64], index: 7, kind: input, shape index: {}]   ;;  %s1449_s8 = inlined_call_operand.vmem [shape: bf16[32,64], index: 8, kind: input, shape index: {}]   ;;  %s1450_s9 = inlined_call_operand.vmem [shape: f32[1,64], index: 9, kind: input, shape index: {}]   ;;  %s1451_s10 = inlined_call_operand.vmem [shape: bf16[64,2], index: 10, kind: input, shape index: {}]   ;;  %s1452_s11 = inlined_call_operand.vmem [shape: f32[1,2], index: 11, kind: input, shape index: {}]   ;;  %s1453_s12 = inlined_call_operand.vmem [shape: f32[16,2], index: 12, kind: output, shape index: {}]  }
   0x1   :  { %18 = vsyncpa [#allocation5], 0  ;;  %s1166_s21 = smov [#allocation2]   ;;  %s1167_s23 = smov [#allocation4]  }
   0x2   :  { %s29_s22 = sshll.u32 %s1166_s21, 4  ;;  %s41_s24 = sshll.u32 %s1167_s23, 4  ;;  %s30_s22 = int_to_ptr.vmem [resolvable:$true] %s29_s22  ;;  %s42_s24 = int_to_ptr.vmem [resolvable:$true] %s41_s24 }
   0x3   :  { %s1130_s25 = scalar_lea.vmem %s30_s22, 48  ;;  %s1134_s26 = scalar_lea.vmem %s30_s22, 64 }
   0x4   :  { %p1131_p0 = scmp.ne.s32.totalorder %s30_s22, %s1130_s25  ;;  %p1135_p1 = scmp.lt.s32.totalorder %s30_s22, %s30_s22 }
   0x5   :  { %p1136_p2 = scmp.lt.s32.totalorder %s1134_s26, %s1130_s25 }
   0x7   :  { %p1137_p3 = por %p1136_p2, %p1135_p1 }
   0x9   :  { %p1138_p4 = pnand %p1137_p3, %p1131_p0 }
   0xb   :  { %1141 = shalt.err (!%p1138_p4)
}
   0xc   :  { %32 = dma.hbm_to_vmem [thread:$0]  %s1443_s2, 48, %s30_s22, [#allocation3]  }
   0xd   :  { %s1150_s29 = scalar_lea.vmem %s42_s24, 16  ;;  %s1154_s30 = scalar_lea.vmem %s42_s24, 32 }
   0xe   :  { %p1151_p5 = scmp.ne.s32.totalorder %s42_s24, %s1150_s29  ;;  %p1155_p6 = scmp.lt.s32.totalorder %s42_s24, %s42_s24 }
   0xf   :  { %p1156_p7 = scmp.lt.s32.totalorder %s1154_s30, %s1150_s29 }
  0x11   :  { %p1157_p8 = por %p1156_p7, %p1155_p6 }
  0x13   :  { %p1158_p9 = pnand %p1157_p8, %p1151_p5 }
  0x15   :  { %1161 = shalt.err (!%p1158_p9)
}
  0x16   :  { %44 = dma.hbm_to_vmem [thread:$0]  %s1445_s4, 16, %s42_s24, [#allocation5]  }
  0x17   :  { %1162 = dma.done.wait [#allocation3], 48  }
  0x18   :  { %1163 = vsyncadd [#allocation3], 4294967248 }
  0x19   :  { %1164 = dma.done.wait [#allocation5], 16  }
  0x1a   :  { %1165 = vsyncadd [#allocation5], 4294967280  ;;  %v1168_v0 = vmov 0.0   ;;  %vm1169_vm0 = vmmov 0   ;;  %v1068_v1 = vld [vmem:[%s1442_s1 + $0x20] ss:$12 sps:$4 sm:$0xff]   ;;  %v79_v6 = vlaneseq }
  0x1b   :  { %1030 = vmatprep.subr.bf16.mxu1 %v1168_v0  ;;  %1034 = vmatprep.mubr.msk.bf16.mxu1 %vm1169_vm0, %v1168_v0  ;;  %v1069_v2 = vld [vmem:[%s1442_s1 + $0x8] ss:$12 sps:$4 sm:$0xff]   ;;  %v66_v3 = vld [vmem:[%s1441_s0] sm:$0xff]  ;;  %vm126_vm1 = vcmask 261120   ;;  %vm396_vm2 = vcmask 64512   ;;  %v1170_v24 = vmov 0  }
  0x1c   :  { %1031 = vmatpush3.bf16.msra.mxu1 %v1068_v1  ;;  %v67_v4 = vld [vmem:[%s1441_s0 + $0x8] sm:$0xff]  ;;  %v1262_v7 = vshrl.u32 %v79_v6, 7  ;;  %v1265_v9 = vld [vmem:[#allocation2] sm:$0x7]  ;;  %v1072_v20 = vld [vmem:[%s1442_s1 + $0x18] ss:$12 sps:$4 sm:$0xff]   ;;  %162 = vmatprep.mubr.bf16.mxu0 %v1170_v24 }
  0x1d   :  { %1032 = vmatprep.subr.bf16.mxu1 %v1168_v0  ;;  %v1258_v5 = vpack.c.bf16 %v67_v4, %v66_v3  ;;  %v1070_v19 = vld [vmem:[%s1442_s1 + $0x1c] ss:$12 sps:$4 sm:$0xff]   ;;  %v1073_v21 = vld [vmem:[%s1442_s1 + $0x4] ss:$12 sps:$4 sm:$0xff]   ;;  %v1075_v22 = vld [vmem:[%s1442_s1] ss:$12 sps:$4 sm:$0xff]  }
  0x1e   :  { %v89_v8 = vsub.s32 2, %v1262_v7  ;;  %142 = vmatprep.subr.bf16.mxu0 %v1070_v19  ;;  %v409_v23 = vld [vmem:[%s1446_s5] sm:$0xff]  ;;  %v1076_v25 = vld [vmem:[%s1444_s3 + $0x78] sm:$0xff]   ;;  %v1078_v27 = vld [vmem:[%s1444_s3 + $0x70] sm:$0xff]   ;;  %v81_v49 = vsub.s32 0, %v1262_v7  ;;  %v85_v50 = vsub.s32 1, %v1262_v7 }
  0x1f   :  { %143 = vmatpush1.bf16.msra.mxu0 %v1072_v20  ;;  %v1077_v26 = vld [vmem:[%s1444_s3 + $0x38] sm:$0xff]   ;;  %v1079_v28 = vld [vmem:[%s1444_s3 + $0x30] sm:$0xff]   ;;  %v1080_v29 = vld [vmem:[%s1444_s3 + $0x68] sm:$0xff]   ;;  %vm863_vm3 = vcmask 523264   ;;  %vm908_vm4 = vcmask 15360  }
  0x20   :  { %1033 = vmatpush3.bf16.msra.mxu1 %v1069_v2  ;;  %v90_v10 = vrot.slane %v1265_v9, %v89_v8  ;;  %144 = vmatprep.subr.bf16.mxu0 %v1073_v21  ;;  %v1081_v30 = vld [vmem:[%s1444_s3 + $0x28] sm:$0xff]   ;;  %v1082_v31 = vld [vmem:[%s1444_s3 + $0x60] sm:$0xff]   ;;  %v1084_v33 = vld [vmem:[%s1444_s3 + $0x58] sm:$0xff]   ;;  %v82_v51 = vrot.slane %v1265_v9, %v81_v49  ;;  %v86_v52 = vrot.slane %v1265_v9, %v85_v50 }
  0x21   :  { %1038 = vmatprep.subr.mxu1 %v409_v23  ;;  %v1083_v32 = vld [vmem:[%s1444_s3 + $0x20] sm:$0xff]   ;;  %v1085_v34 = vld [vmem:[%s1444_s3 + $0x18] sm:$0xff]   ;;  %v1086_v35 = vld [vmem:[%s1444_s3 + $0x50] sm:$0xff]  }
  0x22   :  { %v1087_v36 = vld [vmem:[%s1444_s3 + $0x10] sm:$0xff]   ;;  %v1088_v37 = vld [vmem:[%s1444_s3 + $0x48] sm:$0xff]   ;;  %v1090_v39 = vld [vmem:[%s1444_s3 + $0x40] sm:$0xff]  }
  0x23   :  { %1035 = vmatmul.mubr.msk.bf16.vlgmr.msra.gmra.mxu1 %vm126_vm1, %v1258_v5  ;;  %145 = vmatpush1.bf16.msra.mxu0 %v1075_v22  ;;  %v1089_v38 = vld [vmem:[%s1444_s3 + $0x8] sm:$0xff]   ;;  %v1091_v40 = vld [vmem:[%s1444_s3] sm:$0xff]   ;;  %v1102_v22 = vld [vmem:[%s1448_s7 + $0x58] sm:$0xff]  }
  0x24   :  { %1039 = vmatpush3.msra.mxu1 %v409_v23  ;;  %975 = vmatprep.subr.bf16.mxu0 %v1076_v25  ;;  %v496_v4 = vld [vmem:[%s1447_s6 + $0x8] sm:$0xff]  ;;  %v495_v6 = vld [vmem:[%s1447_s6] sm:$0xff]  ;;  %v1103_v23 = vld [vmem:[%s1448_s7 + $0x18] sm:$0xff]  }
  0x25   :  { %533 = vmatprep.subr.mxu1 %v496_v4  ;;  %v1098_v19 = vld [vmem:[%s1448_s7 + $0x68] sm:$0xff]   ;;  %v1101_v21 = vld [vmem:[%s1448_s7 + $0x20] sm:$0xff]   ;;  %v1104_v24 = vld [vmem:[%s1448_s7 + $0x50] sm:$0xff]  }
  0x26   :  { %923 = vmatmul.mubr.msk.bf16.vlgmr.msra.gmra.mxu0 %vm126_vm1, %v1258_v5  ;;  %v1099_v20 = vld [vmem:[%s1448_s7 + $0x28] sm:$0xff]   ;;  %v1105_v25 = vld [vmem:[%s1448_s7 + $0x10] sm:$0xff]  }
  0x27   :  { %976 = vmatpush3.bf16.msra.mxu0 %v1077_v26  ;;  %v1106_v26 = vld [vmem:[%s1448_s7 + $0x48] sm:$0xff]  }
  0x28   :  { %977 = vmatprep.subr.bf16.mxu0 %v1078_v27  ;;  %v1107_v27 = vld [vmem:[%s1448_s7 + $0x8] sm:$0xff]  }
  0x2b   :  { %978 = vmatpush3.bf16.msra.mxu0 %v1079_v28  ;;  %v1108_v28 = vld [vmem:[%s1448_s7 + $0x40] sm:$0xff]  }
  0x2c   :  { %979 = vmatprep.subr.bf16.mxu0 %v1080_v29  ;;  %v1109_v29 = vld [vmem:[%s1448_s7] sm:$0xff]  }
  0x2f   :  { %980 = vmatpush3.bf16.msra.mxu0 %v1081_v30 }
  0x30   :  { %981 = vmatprep.subr.bf16.mxu0 %v1082_v31 }
  0x33   :  { %982 = vmatpush3.bf16.msra.mxu0 %v1083_v32 }
  0x34   :  { %983 = vmatprep.subr.bf16.mxu0 %v1084_v33 }
  0x37   :  { %984 = vmatpush3.bf16.msra.mxu0 %v1085_v34 }
  0x38   :  { %985 = vmatprep.subr.bf16.mxu0 %v1086_v35 }
  0x3b   :  { %986 = vmatpush3.bf16.msra.mxu0 %v1087_v36 }
  0x3c   :  { %987 = vmatprep.subr.bf16.mxu0 %v1088_v37  ;;  %v925_v37 = vld [vmem:[#allocation4] ss:$0 sm:$0xff] }
  0x3f   :  { %988 = vmatpush3.bf16.msra.mxu0 %v1089_v38 }
  0x40   :  { %989 = vmatprep.subr.bf16.mxu0 %v1090_v39 }
  0x43   :  { %990 = vmatpush3.bf16.msra.mxu0 %v1091_v40 }
  0x44   :  { %1051 = vmatprep.subr.bf16.mxu0 %v1168_v0 }
  0xe3   :  { %v207_v11 = vpop.f32.mrf.mxu1 }
  0xe4   :  { %v208_v12 = vadd.f32 %v207_v11, %v90_v10 }
  0xe5   :  { %v1036_v13 = vpop.f32.mrf.mxu1 }
  0xe6   :  { %v397_v14 = vsel %vm396_vm2, %v208_v12, -inf  ;;  %v164_v53 = vpop.f32.mrf.mxu0  ;;  %v1093_v13 = vld [vmem:[%s1449_s8] sm:$0xff]  }
  0xe7   :  { %398 = vmax.xlane.f32.xlu0 %v397_v14  ;;  %v210_v15 = vpop.f32.mrf.mxu1  ;;  %v165_v54 = vadd.f32 %v164_v53, %v82_v51  ;;  %v1110_v53 = vld [vmem:[%s1451_s10 + $0x18] sm:$0xff]  }
  0xe8   :  { %v211_v16 = vadd.f32 %v210_v15, %v90_v10  ;;  %v166_v55 = vpop.f32.mrf.mxu0  ;;  %v1092_v10 = vld [vmem:[%s1449_s8 + $0x8] sm:$0xff]   ;;  %v1094_v15 = vld [vmem:[%s1448_s7 + $0x78] sm:$0xff]  }
  0xe9   :  { %v1037_v17 = vpop.f32.mrf.mxu1  ;;  %v167_v56 = vadd.f32 %v166_v55, %v86_v52  ;;  %v214_v59 = vmax.f32 %v165_v54, 0.0  ;;  %v1111_v54 = vld [vmem:[%s1451_s10 + $0x10] sm:$0xff]   ;;  %v1112_v55 = vld [vmem:[%s1451_s10 + $0x8] sm:$0xff]  }
  0xea   :  { %v400_v18 = vsel %vm396_vm2, %v211_v16, -inf  ;;  %v168_v57 = vpop.f32.mrf.mxu0  ;;  %v1096_v17 = vld [vmem:[%s1448_s7 + $0x70] sm:$0xff]  }
  0xeb   :  { %401 = vmax.xlane.f32.xlu0 %v400_v18  ;;  %v169_v58 = vadd.f32 %v168_v57, %v82_v51  ;;  %v215_v61 = vmax.f32 %v167_v56, 0.0  ;;  %v1097_v18 = vld [vmem:[%s1448_s7 + $0x30] sm:$0xff]   ;;  %v1113_v56 = vld [vmem:[%s1451_s10] sm:$0xff]  }
  0xec   :  { %v170_v60 = vpop.f32.mrf.mxu0 }
  0xed   :  { %v216_v62 = vmax.f32 %v169_v58, 0.0  ;;  %v171_v63 = vadd.f32 %v170_v60, %v86_v52 }
  0xef   :  { %v217_v1 = vmax.f32 %v171_v63, 0.0  ;;  %v218_v2 = vpack.c.bf16 %v216_v62, %v214_v59  ;;  %v965_v62 = vld [vmem:[%s1450_s9] ss:$0 sm:$0xff] }
  0xf1   :  { %v219_v3 = vpack.c.bf16 %v217_v1, %v215_v61 }
  0xf3   :  { %387 = vmatprep.mubr.bf16.mxu0 %v219_v3 }
  0xf4   :  { %388 = vmatmul.mubr.bf16.vlgmr.msra.gmra.mxu0 %v218_v2 }
  0xf5   :  { %1059 = vmatprep.mubr.msk.bf16.mxu0 %vm1169_vm0, %v1168_v0  ;;  %1052 = vmatpush3.bf16.msra.mxu0 %v1110_v53 }
  0xf6   :  { %1053 = vmatprep.subr.bf16.mxu0 %v1168_v0 }
  0xf9   :  { %1054 = vmatpush3.bf16.msra.mxu0 %v1111_v54 }
  0xfa   :  { %1055 = vmatprep.subr.bf16.mxu0 %v1168_v0 }
  0xfd   :  { %1056 = vmatpush3.bf16.msra.mxu0 %v1112_v55 }
  0xfe   :  { %1057 = vmatprep.subr.bf16.mxu0 %v1168_v0 }
 0x101   :  { %1058 = vmatpush3.bf16.msra.mxu0 %v1113_v56 }
 0x170   :  { %v399_v41 = vpop.xlane.xlu0 %398 }
 0x171   :  { %v403_v42 = vsub.f32 %v208_v12, %v399_v41 }
 0x173   :  { %v405_v43 = vmul.f32 1.442695, %v403_v42 }
 0x174   :  { %v402_v44 = vpop.xlane.xlu0 %401 }
 0x175   :  { %1114 = vpow2.f32 %v405_v43  ;;  %v404_v45 = vsub.f32 %v211_v16, %v402_v44  ;;  %v1095_v16 = vld [vmem:[%s1448_s7 + $0x38] sm:$0xff]  }
 0x177   :  { %v407_v46 = vmul.f32 1.442695, %v404_v45 }
 0x179   :  { %1116 = vpow2.f32 %v407_v46 }
 0x182   :  { %v1115_v47 = vpop.eup %1114 }
 0x183   :  { %1040 = vmatprep.mubr.msk.f32.mxu1 %vm396_vm2, %v1115_v47 }
 0x186   :  { %v1117_v48 = vpop.eup %1116 }
 0x187   :  { %1041 = vmatmul.mubr.msk.f32.vlgmr.msra.gmra.mxu1 %vm396_vm2, %v1117_v48 }
 0x188   :  { %567 = vmatprep.mubr.f32.mxu1 %v1168_v0  ;;  %534 = vmatpush1.msra.mxu1 %v495_v6 }
 0x189   :  { %1043 = vmatprep.subr.bf16.mxu1 %v1168_v0 }
 0x1b4   :  { %v991_v30 = vpop.f32.mrf.mxu0 }
 0x1b6   :  { %v992_v31 = vpop.f32.mrf.mxu0 }
 0x1b7   :  { %v993_v36 = vadd.f32 %v992_v31, %v991_v30 }
 0x1b8   :  { %v994_v32 = vpop.f32.mrf.mxu0 }
 0x1b9   :  { %v390_v41 = vadd.f32 %v993_v36, %v925_v37 }
 0x1ba   :  { %v995_v33 = vpop.f32.mrf.mxu0 }
 0x1bb   :  { %v996_v34 = vadd.f32 %v995_v33, %v994_v32 }
 0x1bd   :  { %v393_v39 = vadd.f32 %v996_v34, %v925_v37 }
 0x247   :  { %v1042_v7 = vpop.f32.mrf.mxu1 }
 0x249   :  { %v482_v8 = vpop.f32.mrf.mxu1 }
 0x24a   :  { %1118 = vrcp.f32 %v482_v8  ;;  %v966_v8 = vld [vmem:[%s1452_s11] ss:$0 sm:$0xff] }
 0x24b   :  { %1120 = vrcp.f32 %v1042_v7 }
 0x257   :  { %v1119_v9 = vpop.eup %1118 }
 0x258   :  { %v492_v11 = vmul.f32 %v1119_v9, %v1115_v47  ;;  %v1121_v12 = vpop.eup %1120 }
 0x259   :  { %v494_v14 = vmul.f32 %v1121_v12, %v1117_v48 }
 0x25a   :  { %944 = vmatmul.mubr.msk.f32.vlgmr.msra.gmra.mxu1 %vm396_vm2, %v492_v11 }
 0x25b   :  { %573 = vmatprep.mubr.f32.mxu1 %v1168_v0  ;;  %1044 = vmatpush3.bf16.msra.mxu1 %v1092_v10 }
 0x25c   :  { %1045 = vmatprep.subr.bf16.mxu1 %v1168_v0 }
 0x25e   :  { %945 = vmatmul.mubr.msk.f32.gmra.mxu1 %vm396_vm2, %v494_v14 }
 0x25f   :  { %1046 = vmatpush3.bf16.msra.mxu1 %v1093_v13  ;;  %1047 = vmatprep.mubr.msk.bf16.mxu1 %vm1169_vm0, %v1168_v0 }
 0x260   :  { %1003 = vmatprep.subr.bf16.mxu1 %v1094_v15 }
 0x262   :  { %1048 = vmatmul.mubr.msk.bf16.vlgmr.msra.gmra.mxu1 %vm126_vm1, %v1258_v5  ;;  %v1100_v5 = vld [vmem:[%s1448_s7 + $0x60] sm:$0xff]  }
 0x263   :  { %1004 = vmatpush3.bf16.msra.mxu1 %v1095_v16 }
 0x264   :  { %1005 = vmatprep.subr.bf16.mxu1 %v1096_v17 }
 0x267   :  { %1006 = vmatpush3.bf16.msra.mxu1 %v1097_v18 }
 0x268   :  { %1007 = vmatprep.subr.bf16.mxu1 %v1098_v19 }
 0x26b   :  { %1008 = vmatpush3.bf16.msra.mxu1 %v1099_v20 }
 0x26c   :  { %1009 = vmatprep.subr.bf16.mxu1 %v1100_v5 }
 0x26f   :  { %1010 = vmatpush3.bf16.msra.mxu1 %v1101_v21 }
 0x270   :  { %1011 = vmatprep.subr.bf16.mxu1 %v1102_v22 }
 0x273   :  { %1012 = vmatpush3.bf16.msra.mxu1 %v1103_v23 }
 0x274   :  { %1013 = vmatprep.subr.bf16.mxu1 %v1104_v24 }
 0x277   :  { %1014 = vmatpush3.bf16.msra.mxu1 %v1105_v25 }
 0x278   :  { %1015 = vmatprep.subr.bf16.mxu1 %v1106_v26 }
 0x27b   :  { %1016 = vmatpush3.bf16.msra.mxu1 %v1107_v27 }
 0x27c   :  { %1017 = vmatprep.subr.bf16.mxu1 %v1108_v28 }
 0x27f   :  { %1018 = vmatpush3.bf16.msra.mxu1 %v1109_v29 }
 0x31a   :  { %v569_v35 = vpop.f32.mrf.mxu1 }
 0x31b   :  { %v580_v46 = vmul.f32 %v569_v35, %v390_v41 }
 0x31c   :  { %v571_v38 = vpop.f32.mrf.mxu1 }
 0x31d   :  { %v581_v44 = vmul.f32 %v571_v38, %v390_v41 }
 0x31e   :  { %v575_v40 = vpop.f32.mrf.mxu1 }
 0x31f   :  { %v582_v42 = vmul.f32 %v575_v40, %v393_v39 }
 0x320   :  { %v577_v43 = vpop.f32.mrf.mxu1 }
 0x321   :  { %v583_v45 = vmul.f32 %v577_v43, %v393_v39  ;;  %v584_v49 = vpack.c.bf16 %v582_v42, %v580_v46 }
 0x322   :  { %v668_v47 = vpop.f32.mrf.mxu1 }
 0x323   :  { %v585_v48 = vpack.c.bf16 %v583_v45, %v581_v44 }
 0x324   :  { %v1049_v50 = vpop.f32.mrf.mxu1 }
 0x325   :  { %803 = vmatprep.mubr.bf16.mxu1 %v585_v48 }
 0x326   :  { %804 = vmatmul.mubr.bf16.vlgmr.msra.gmra.mxu1 %v584_v49  ;;  %v671_v51 = vpop.f32.mrf.mxu1 }
 0x328   :  { %v1050_v52 = vpop.f32.mrf.mxu1 }
 0x3e6   :  { %v1019_v57 = vpop.f32.mrf.mxu1 }
 0x3e8   :  { %v1020_v58 = vpop.f32.mrf.mxu1 }
 0x3e9   :  { %v1021_v59 = vadd.f32 %v1020_v58, %v1019_v57 }
 0x3ea   :  { %v1022_v60 = vpop.f32.mrf.mxu1 }
 0x3eb   :  { %v806_v61 = vadd.f32 %v1021_v59, %v668_v47 }
 0x3ec   :  { %v1023_v63 = vpop.f32.mrf.mxu1 }
 0x3ed   :  { %v1024_v1 = vadd.f32 %v1023_v63, %v1022_v60  ;;  %v819_v2 = vadd.f32 %v965_v62, %v806_v61 }
 0x3ef   :  { %v809_v3 = vadd.f32 %v1024_v1, %v671_v51  ;;  %v821_v0 = vmax.f32 %v819_v2, 0.0 }
 0x3f1   :  { %v820_v4 = vadd.f32 %v965_v62, %v809_v3 }
 0x3f3   :  { %v822_v6 = vmax.f32 %v820_v4, 0.0 }
 0x3f5   :  { %v823_v7 = vpack.c.bf16 %v822_v6, %v821_v0 }
 0x3f7   :  { %1060 = vmatmul.mubr.msk.bf16.vlgmr.msra.gmra.mxu0 %vm863_vm3, %v823_v7 }
 0x4b7   :  { %v901_v9 = vpop.f32.mrf.mxu0 }
 0x4b8   :  { %v902_v10 = vadd.f32 %v966_v8, %v901_v9 }
 0x4b9   :  { %v1061_v11 = vpop.f32.mrf.mxu0 }
 0x4ba   :  { %909 = vst.msk [vmem:[%s1453_s12] sm:$0xff] %vm908_vm4, %v902_v10 }
 0x4bb   :  { %v904_v12 = vpop.f32.mrf.mxu0 }
 0x4bc   :  { %v905_v13 = vadd.f32 %v966_v8, %v904_v12 }
 0x4bd   :  { %v1062_v14 = vpop.f32.mrf.mxu0 }
 0x4be   :  { %910 = vst.msk [vmem:[%s1453_s12 + $0x8] sm:$0xff] %vm908_vm4, %v905_v13 }
 0x4bf   :  { %915 = vsyncpa [#allocation3], 1 }
 0x4c0   :  { %916 = vsyncpa [#allocation5], 1 }

</bundles_post_ra>
